<compile_context>
chip_gen: v5e
topology: v5e:2x2
jax: 0.10.0
libtpu: 0.0.40
codegen_flags: <defaults>
</compile_context>

<pallas_src>
import functools

import jax
import jax.numpy as jnp
from jax import lax
from jax.experimental import pallas as pl
from jax.experimental.pallas import tpu as pltpu


def _sumsq_dev_kernel(x_ref, out_ref, shift_ref, sum_acc, sq_acc, *,
                      n_rows, rows_per_tile, chunk_rows, ragged, inv_n):
    """Accumulate per-column sum / sum-of-squares of (x - shift) over row tiles.

    Grid: (d_blocks [parallel], row_tiles [arbitrary]).
    x_ref:     (rows_per_tile, d_block) tile of the input, VMEM.
    out_ref:   (1, 1) f32 partial result for this d block, SMEM.
    shift_ref: (8, d_block) f32 per-column shift (row 0 broadcast), VMEM.
    sum_acc,
    sq_acc:    (8, d_block) f32 accumulators, resident across row steps.
    """
    row_step = pl.program_id(1)
    d_block = x_ref.shape[-1]
    num_chunks = rows_per_tile // chunk_rows

    @pl.when(row_step == 0)
    def _init():
        # Per-column shift = row 0 of this column block (always valid, N >= 1).
        row0 = x_ref[pl.ds(0, 8), :].astype(jnp.float32)[0:1, :]
        shift_ref[...] = jnp.broadcast_to(row0, shift_ref.shape)
        sum_acc[...] = jnp.zeros_like(sum_acc)
        sq_acc[...] = jnp.zeros_like(sq_acc)

    tile_row0 = row_step * rows_per_tile
    shift = shift_ref[...]                      # hoisted once per grid step

    def _accumulate(mask_rows):
        def body(c, carry):
            start = pl.multiple_of(c * chunk_rows, chunk_rows)
            # Cast at use: only a chunk-sized f32 temporary ever exists.
            xc = x_ref[pl.ds(start, chunk_rows), :].astype(jnp.float32)
            # (chunk, d) -> (chunk//8, 8, d): reduction over the leading axis is
            # pure element-wise vreg adds (VPU); XLU only in the epilogue.
            x3 = xc.reshape(chunk_rows // 8, 8, d_block) - shift
            if mask_rows:
                rid = (jax.lax.broadcasted_iota(jnp.int32, x3.shape, 0) * 8
                       + jax.lax.broadcasted_iota(jnp.int32, x3.shape, 1))
                valid = (tile_row0 + start + rid) < n_rows
                x3 = jnp.where(valid, x3, 0.0)   # select: stale-VMEM NaNs do not propagate
            sum_acc[...] += jnp.sum(x3, axis=0)
            sq_acc[...] += jnp.sum(x3 * x3, axis=0)
            return carry
        lax.fori_loop(0, num_chunks, body, 0)

    if not ragged:
        _accumulate(mask_rows=False)
    else:
        last_step = pl.num_programs(1) - 1

        @pl.when(row_step != last_step)
        def _full_tiles():
            _accumulate(mask_rows=False)

        @pl.when(row_step == last_step)
        def _ragged_tile():
            _accumulate(mask_rows=True)

    @pl.when(row_step == pl.num_programs(1) - 1)
    def _finalize():
        # One-time cross-sublane/cross-lane (XLU) reductions.
        col_sum = jnp.sum(sum_acc[...], axis=0, keepdims=True)   # (1, d_block)
        col_sq = jnp.sum(sq_acc[...], axis=0, keepdims=True)     # (1, d_block)
        # sum((x - mean)^2) over this column block (shift-invariant identity).
        out_ref[0, 0] = jnp.sum(col_sq - col_sum * col_sum * inv_n)


def _round_up(x, m):
    return ((x + m - 1) // m) * m


def _tpu_vmem_bytes():
    try:
        return int(pltpu.get_tpu_info().vmem_capacity_bytes)
    except Exception:
        return 64 * 1024 * 1024   # conservative (v7x per-TC VMEM)


def _pick_d_block(d):
    """Column-block width.  Wide lane-aligned D is split into multiple-of-128
    blocks: gives the grid a 'parallel' axis (v7x second TC shares the stream)
    and caps the (8, d_block) f32 accumulators for very wide D."""
    if d % 128 != 0 or d <= 2048:
        return d
    d_block = d
    while d_block % 2 == 0 and (d_block // 2) >= 2048 and (d_block // 2) % 128 == 0:
        d_block //= 2
    return d_block


def _sum_sq_dev(x, *, rows_per_tile=None, chunk_rows=None, d_block=None):
    """sum((x - mean(x, axis=0))**2) as a tiled streaming Pallas reduction."""
    n = x.shape[0]
    assert n >= 1, "need at least one row"
    x = x.reshape(n, -1)                 # loss is separable over trailing dims
    d = x.shape[1]
    itemsize = x.dtype.itemsize
    row_align = max(8, 32 // max(1, itemsize))     # 8 f32 / 16 bf16 / 32 int8-fp8

    vmem = _tpu_vmem_bytes()
    tile_bytes = min(16 * 1024 * 1024, vmem // 5)  # per-buffer DMA block budget
    vmem_limit = int(min((vmem * 3) // 4, 96 * 1024 * 1024))

    if d_block is None:
        d_block = _pick_d_block(d)
    assert d % d_block == 0 and (d_block == d or d_block % 128 == 0)
    num_d_blocks = d // d_block

    if chunk_rows is None:
        # Bound the chunk-sized f32 temporaries to ~0.5 MiB.
        chunk_rows = (512 * 1024) // max(1, 4 * d_block)
        chunk_rows = max(row_align, (chunk_rows // row_align) * row_align)
        chunk_rows = min(chunk_rows, 512)
        chunk_rows = min(chunk_rows, _round_up(n, row_align))
    assert chunk_rows % row_align == 0 and chunk_rows >= 8

    if rows_per_tile is None:
        budget_rows = max(1, tile_bytes // max(1, d_block * itemsize))
        chunks_per_tile = max(1, budget_rows // chunk_rows)
        chunks_per_tile = min(chunks_per_tile, -(-n // chunk_rows))
        rows_per_tile = chunks_per_tile * chunk_rows
    assert rows_per_tile % chunk_rows == 0

    grid_rows = pl.cdiv(n, rows_per_tile)
    ragged = (grid_rows * rows_per_tile != n)

    kernel = functools.partial(
        _sumsq_dev_kernel, n_rows=n, rows_per_tile=rows_per_tile,
        chunk_rows=chunk_rows, ragged=ragged, inv_n=1.0 / n)

    out = pl.pallas_call(
        kernel,
        out_shape=jax.ShapeDtypeStruct((num_d_blocks, 1), jnp.float32),
        grid_spec=pltpu.PrefetchScalarGridSpec(
            num_scalar_prefetch=0,
            # (column blocks [parallel], row tiles [arbitrary/reduction])
            grid=(num_d_blocks, grid_rows),
            in_specs=[
                pl.BlockSpec((rows_per_tile, d_block), lambda j, i: (i, j)),
            ],
            out_specs=pl.BlockSpec((1, 1), lambda j, i: (j, 0),
                                   memory_space=pltpu.SMEM),
            scratch_shapes=[
                pltpu.VMEM((8, d_block), jnp.float32),   # per-column shift
                pltpu.VMEM((8, d_block), jnp.float32),   # running sum(x - s)
                pltpu.VMEM((8, d_block), jnp.float32),   # running sum((x - s)^2)
            ],
        ),
        compiler_params=pltpu.CompilerParams(
            dimension_semantics=("parallel", "arbitrary"),
            vmem_limit_bytes=vmem_limit,
        ),
    )(x)
    return jnp.sum(out)


def cmm_loss(source: jax.Array, target: jax.Array) -> jax.Array:
    """Pallas CMM_Loss: sum((s - s.mean(0))**2) + sum((t - t.mean(0))**2)."""
    return _sum_sq_dev(source) + _sum_sq_dev(target)


def cmm_loss_ref(source, target):
    s_mean = jnp.mean(source, axis=0)
    t_mean = jnp.mean(target, axis=0)
    return jnp.sum((source - s_mean) ** 2) + jnp.sum((target - t_mean) ** 2)


if __name__ == "__main__":
    key = jax.random.PRNGKey(0)
    k1, k2, k3, k4, k5, k6 = jax.random.split(key, 6)

    # 1) Basic small, lane-aligned shapes (single tile, single column block).
    source = jax.random.normal(k1, (16, 128), dtype=jnp.float32)
    target = jax.random.normal(k2, (16, 128), dtype=jnp.float32)
    loss = cmm_loss(source, target)
    jax.block_until_ready(loss)
    ref = cmm_loss_ref(source, target)
    assert jnp.allclose(loss, ref, rtol=1e-4, atol=1e-3), (loss, ref)

    # 2) Multi-tile + ragged tail (N=70 vs 32-row tiles) with large per-column
    #    means (exercises chunked accumulation, in-kernel masking, and the
    #    shifted one-pass numerics).
    s2 = jax.random.normal(k3, (70, 128), dtype=jnp.float32) + 100.0
    t2 = jax.random.normal(k4, (70, 128), dtype=jnp.float32) - 50.0
    loss2 = (_sum_sq_dev(s2, rows_per_tile=32, chunk_rows=16)
             + _sum_sq_dev(t2, rows_per_tile=32, chunk_rows=16))
    jax.block_until_ready(loss2)
    ref2 = cmm_loss_ref(s2, t2)
    assert jnp.allclose(loss2, ref2, rtol=1e-3, atol=1e-1), (loss2, ref2)

    # 3) Column-split path: parallel D axis with two 128-wide blocks.
    s3 = jax.random.normal(k5, (48, 256), dtype=jnp.float32)
    t3 = jax.random.normal(k6, (48, 256), dtype=jnp.float32)
    loss3 = _sum_sq_dev(s3, d_block=128) + _sum_sq_dev(t3, d_block=128)
    jax.block_until_ready(loss3)
    ref3 = cmm_loss_ref(s3, t3)
    assert jnp.allclose(loss3, ref3, rtol=1e-4, atol=1e-3), (loss3, ref3)

    # 4) Unaligned N (not a multiple of 8) and non-128 D: single ragged tile.
    s4 = jax.random.normal(k1, (20, 96), dtype=jnp.float32)
    t4 = jax.random.normal(k2, (20, 96), dtype=jnp.float32)
    loss4 = cmm_loss(s4, t4)
    jax.block_until_ready(loss4)
    ref4 = cmm_loss_ref(s4, t4)
    assert jnp.allclose(loss4, ref4, rtol=1e-4, atol=1e-3), (loss4, ref4)

    # 5) bf16 input (16-row sublane-packed alignment path, cast-at-use).
    s5 = jax.random.normal(k3, (64, 128), dtype=jnp.bfloat16)
    t5 = jax.random.normal(k4, (64, 128), dtype=jnp.bfloat16)
    loss5 = cmm_loss(s5, t5)
    jax.block_until_ready(loss5)
    ref5 = cmm_loss_ref(s5.astype(jnp.float32), t5.astype(jnp.float32))
    assert jnp.allclose(loss5, ref5, rtol=1e-3, atol=1e-1), (loss5, ref5)

    print("KERNEL_OK")
</pallas_src>

<mosaic_0001>
module attributes {stable_mosaic.version = 11 : i64} {
  func.func @_sumsq_dev_kernel(%arg0: i32, %arg1: i32, %arg2: memref<16x128xf32, #tpu.memory_space<vmem>>, %arg3: memref<1x1xf32, #tpu.memory_space<smem>>, %arg4: memref<8x128xf32, #tpu.memory_space<vmem>>, %arg5: memref<8x128xf32, #tpu.memory_space<vmem>>, %arg6: memref<8x128xf32, #tpu.memory_space<vmem>>) attributes {dimension_semantics = [#tpu.dimension_semantics<parallel>, #tpu.dimension_semantics<arbitrary>], iteration_bounds = array<i64: 1, 1>, scalar_prefetch = 0 : i64, scratch_operands = 3 : i64, tpu.core_type = #tpu.core_type<tc>, window_params = [{transform_indices = @transform_0, window_bounds = array<i64: 16, 128>}, {transform_indices = @transform_1, window_bounds = array<i64: 1, 1>}]} {
    %c0_i32 = arith.constant 0 : i32
    %0 = arith.cmpi eq, %arg1, %c0_i32 : i32
    %1 = arith.extui %0 : i1 to i32
    %c0_i32_0 = arith.constant 0 : i32
    %2 = arith.cmpi ne, %1, %c0_i32_0 : i32
    scf.if %2 {
      %c0_15 = arith.constant 0 : index
      %c0_16 = arith.constant 0 : index
      %24 = vector.load %arg2[%c0_15, %c0_16] : memref<16x128xf32, #tpu.memory_space<vmem>>, vector<8x128xf32>
      %25 = vector.extract_strided_slice %24 {offsets = [0, 0], sizes = [1, 128], strides = [1, 1]} : vector<8x128xf32> to vector<1x128xf32>
      %26 = vector.shape_cast %25 : vector<1x128xf32> to vector<1x128xf32>
      %27 = vector.broadcast %26 : vector<1x128xf32> to vector<8x128xf32>
      %c0_17 = arith.constant 0 : index
      %c0_18 = arith.constant 0 : index
      %28 = vector.load %arg4[%c0_17, %c0_18] : memref<8x128xf32, #tpu.memory_space<vmem>>, vector<8x128xf32>
      tpu.vector_store %arg4[%c0_17, %c0_18], %27 {strides = array<i32>} : memref<8x128xf32, #tpu.memory_space<vmem>>, vector<8x128xf32>,
      %cst_19 = arith.constant 0.000000e+00 : f32
      %29 = vector.broadcast %cst_19 : f32 to vector<8x128xf32>
      %c0_20 = arith.constant 0 : index
      %c0_21 = arith.constant 0 : index
      %30 = vector.load %arg5[%c0_20, %c0_21] : memref<8x128xf32, #tpu.memory_space<vmem>>, vector<8x128xf32>
      tpu.vector_store %arg5[%c0_20, %c0_21], %29 {strides = array<i32>} : memref<8x128xf32, #tpu.memory_space<vmem>>, vector<8x128xf32>,
      %cst_22 = arith.constant 0.000000e+00 : f32
      %31 = vector.broadcast %cst_22 : f32 to vector<8x128xf32>
      %c0_23 = arith.constant 0 : index
      %c0_24 = arith.constant 0 : index
      %32 = vector.load %arg6[%c0_23, %c0_24] : memref<8x128xf32, #tpu.memory_space<vmem>>, vector<8x128xf32>
      tpu.vector_store %arg6[%c0_23, %c0_24], %31 {strides = array<i32>} : memref<8x128xf32, #tpu.memory_space<vmem>>, vector<8x128xf32>,
    } else {
    }
    %c0 = arith.constant 0 : index
    %c0_1 = arith.constant 0 : index
    %3 = vector.load %arg4[%c0, %c0_1] : memref<8x128xf32, #tpu.memory_space<vmem>>, vector<8x128xf32>
    %c0_i32_2 = arith.constant 0 : i32
    %c16_i32 = arith.constant 16 : i32
    %4 = arith.muli %c0_i32_2, %c16_i32 : i32
    %5 = tpu.assume_multiple %4, 16 : i32
    %6 = arith.index_cast %5 : i32 to index
    %c0_3 = arith.constant 0 : index
    %7 = vector.load %arg2[%6, %c0_3] : memref<16x128xf32, #tpu.memory_space<vmem>>, vector<16x128xf32>
    %8 = vector.shape_cast %7 : vector<16x128xf32> to vector<2x8x128xf32>
    %9 = vector.shape_cast %3 : vector<8x128xf32> to vector<1x8x128xf32>
    %10 = vector.broadcast %9 : vector<1x8x128xf32> to vector<2x8x128xf32>
    %11 = arith.subf %8, %10 : vector<2x8x128xf32>
    %c0_4 = arith.constant 0 : index
    %c0_5 = arith.constant 0 : index
    %12 = vector.load %arg5[%c0_4, %c0_5] : memref<8x128xf32, #tpu.memory_space<vmem>>, vector<8x128xf32>
    %cst = arith.constant dense<0.000000e+00> : vector<8x128xf32>
    %13 = vector.multi_reduction <add>, %11, %cst [0] : vector<2x8x128xf32> to vector<8x128xf32>
    %14 = arith.addf %12, %13 : vector<8x128xf32>
    %c0_6 = arith.constant 0 : index
    %c0_7 = arith.constant 0 : index
    %15 = vector.load %arg5[%c0_6, %c0_7] : memref<8x128xf32, #tpu.memory_space<vmem>>, vector<8x128xf32>
    tpu.vector_store %arg5[%c0_6, %c0_7], %14 {strides = array<i32>} : memref<8x128xf32, #tpu.memory_space<vmem>>, vector<8x128xf32>,
    %c0_8 = arith.constant 0 : index
    %c0_9 = arith.constant 0 : index
    %16 = vector.load %arg6[%c0_8, %c0_9] : memref<8x128xf32, #tpu.memory_space<vmem>>, vector<8x128xf32>
    %17 = arith.mulf %11, %11 : vector<2x8x128xf32>
    %cst_10 = arith.constant dense<0.000000e+00> : vector<8x128xf32>
    %18 = vector.multi_reduction <add>, %17, %cst_10 [0] : vector<2x8x128xf32> to vector<8x128xf32>
    %19 = arith.addf %16, %18 : vector<8x128xf32>
    %c0_11 = arith.constant 0 : index
    %c0_12 = arith.constant 0 : index
    %20 = vector.load %arg6[%c0_11, %c0_12] : memref<8x128xf32, #tpu.memory_space<vmem>>, vector<8x128xf32>
    tpu.vector_store %arg6[%c0_11, %c0_12], %19 {strides = array<i32>} : memref<8x128xf32, #tpu.memory_space<vmem>>, vector<8x128xf32>,
    %c1_i32 = arith.constant 1 : i32
    %c0_i32_13 = arith.constant 0 : i32
    %21 = arith.cmpi eq, %arg1, %c0_i32_13 : i32
    %22 = arith.extui %21 : i1 to i32
    %c0_i32_14 = arith.constant 0 : i32
    %23 = arith.cmpi ne, %22, %c0_i32_14 : i32
    scf.if %23 {
      %c0_15 = arith.constant 0 : index
      %c0_16 = arith.constant 0 : index
      %24 = vector.load %arg5[%c0_15, %c0_16] : memref<8x128xf32, #tpu.memory_space<vmem>>, vector<8x128xf32>
      %cst_17 = arith.constant dense<0.000000e+00> : vector<128xf32>
      %25 = vector.multi_reduction <add>, %24, %cst_17 [0] : vector<8x128xf32> to vector<128xf32>
      %26 = vector.shape_cast %25 : vector<128xf32> to vector<1x128xf32>
      %c0_18 = arith.constant 0 : index
      %c0_19 = arith.constant 0 : index
      %27 = vector.load %arg6[%c0_18, %c0_19] : memref<8x128xf32, #tpu.memory_space<vmem>>, vector<8x128xf32>
      %cst_20 = arith.constant dense<0.000000e+00> : vector<128xf32>
      %28 = vector.multi_reduction <add>, %27, %cst_20 [0] : vector<8x128xf32> to vector<128xf32>
      %29 = vector.shape_cast %28 : vector<128xf32> to vector<1x128xf32>
      %30 = arith.mulf %26, %26 : vector<1x128xf32>
      %cst_21 = arith.constant 6.250000e-02 : f32
      %31 = vector.broadcast %cst_21 : f32 to vector<1x128xf32>
      %32 = arith.mulf %30, %31 : vector<1x128xf32>
      %33 = arith.subf %29, %32 : vector<1x128xf32>
      %34 = vector.shape_cast %33 : vector<1x128xf32> to vector<1x1x128xf32>
      %cst_22 = arith.constant dense<0.000000e+00> : vector<1xf32>
      %35 = vector.multi_reduction <add>, %34, %cst_22 [1, 2] : vector<1x1x128xf32> to vector<1xf32>
      %36 = vector.shape_cast %35 : vector<1xf32> to vector<1x1x1xf32>
      %37 = vector.extract %36[0, 0, 0] : f32 from vector<1x1x1xf32>
      %c0_23 = arith.constant 0 : index
      %c0_24 = arith.constant 0 : index
      %38 = memref.load %arg3[%c0_23, %c0_24] : memref<1x1xf32, #tpu.memory_space<smem>>
      memref.store %37, %arg3[%c0_23, %c0_24] : memref<1x1xf32, #tpu.memory_space<smem>>
    } else {
    }
    return
  }
  func.func @transform_0(%arg0: i32, %arg1: i32) -> (i32, i32) {
    %c0_i32 = arith.constant 0 : i32
    return %arg1, %arg0 : i32, i32
  }
  func.func @transform_1(%arg0: i32, %arg1: i32) -> (i32, i32) {
    %c0_i32 = arith.constant 0 : i32
    %c0_i32_0 = arith.constant 0 : i32
    return %arg0, %c0_i32 : i32, i32
  }
}

</mosaic_0001>

<bundles_post_ra>
// kernel: tpu_custom_call.1
= control target key start
LH: loop header
LB: loop body
LE: loop exit
PB: predicated region body
PF: predicated region fallthrough
CT: control target
= control target key end

     0   :  { %6 = vsyncpa [#allocation6], 0  ;;  %s164_s0 = inlined_call_operand.hbm [shape: f32[16,128], index: 0, kind: input, shape index: {}]   ;;  %s165_s1 = inlined_call_operand.hbm [shape: f32[1,1], index: 1, kind: output, shape index: {}]  }
   0x1   :  { %7 = vsyncpa [#allocation7], 0  ;;  %s12_s8 = sshll.u32 %s164_s0, 4  ;;  %s144_s9 = smov [#allocation5]   ;;  %s13_s8 = int_to_ptr.hbm [resolvable:$true] %s12_s8 }
   0x2   :  { %s14_s10 = sshll.u32 %s144_s9, 4  ;;  %s145_s11 = smov 128   ;;  %s15_s10 = int_to_ptr.vmem [resolvable:$true] %s14_s10 }
   0x3   :  { %s146_s12 = smov 8  }
   0x4   :  { %20 = dma.hbm_to_vmem [thread:$0]  %s13_s8, 256, %s15_s10, [#allocation6], %s145_s11, %s145_s11, %s146_s12  }
   0x5   :  { %140 = dma.done.wait [#allocation6], 256  }
   0x6   :  { %141 = vsyncadd [#allocation6], 4294967040  ;;  %v29_v0 = vld [vmem:[#allocation5] sm:$0xff]  ;;  %v36_v1 = vld [vmem:[#allocation5 + $0x8] sm:$0xff]  ;;  %vm69_vm0 = vcmask 1040384   ;;  %s87_s14 = sshll.u32 %s165_s1, 4  ;;  %s88_s14 = int_to_ptr.hbm [resolvable:$true] %s87_s14 }
   0x7   :  { %v30_v2 = vperm.slane %v29_v0, 0  ;;  %s147_s16 = smov [#allocation8]  }
   0x9   :  { %v37_v3 = vsub.f32 %v29_v0, %v30_v2  ;;  %v38_v4 = vsub.f32 %v36_v1, %v30_v2 }
   0xb   :  { %v40_v5 = vadd.f32 %v38_v4, %v37_v3  ;;  %v44_v6 = vmul.f32 %v37_v3, %v37_v3  ;;  %v45_v7 = vmul.f32 %v38_v4, %v38_v4 }
   0xd   :  { %v46_v8 = vadd.f32 %v45_v7, %v44_v6  ;;  %v53_v9 = vrot.slane %v40_v5, 4 }
   0xf   :  { %v54_v10 = vadd.f32 %v53_v9, %v40_v5  ;;  %v60_v11 = vrot.slane %v46_v8, 4 }
  0x11   :  { %v55_v12 = vrot.slane %v54_v10, 2  ;;  %v61_v13 = vadd.f32 %v60_v11, %v46_v8 }
  0x13   :  { %v56_v14 = vadd.f32 %v55_v12, %v54_v10  ;;  %v62_v15 = vrot.slane %v61_v13, 2 }
  0x15   :  { %v57_v16 = vrot.slane %v56_v14, 1  ;;  %v63_v17 = vadd.f32 %v62_v15, %v61_v13 }
  0x17   :  { %v58_v18 = vadd.f32 %v57_v16, %v56_v14  ;;  %v64_v19 = vrot.slane %v63_v17, 1 }
  0x19   :  { %v65_v20 = vadd.f32 %v64_v19, %v63_v17  ;;  %v66_v21 = vmul.f32 %v58_v18, %v58_v18 }
  0x1b   :  { %v67_v22 = vmul.f32 0.0625, %v66_v21 }
  0x1d   :  { %v68_v23 = vsub.f32 %v65_v20, %v67_v22 }
  0x1f   :  { %v70_v24 = vsel %vm69_vm0, %v68_v23, 0.0 }
  0x20   :  { %71 = vadd.xlane.f32.xlu0 %v70_v24 }
  0x93   :  { %v72_v25 = vpop.xlane.xlu0 %71 }
  0x94   :  { %v73_v26 = vrot.slane %v72_v25, 4 }
  0x96   :  { %v74_v27 = vadd.f32 %v73_v26, %v72_v25 }
  0x98   :  { %v75_v28 = vrot.slane %v74_v27, 2 }
  0x9a   :  { %v76_v29 = vadd.f32 %v75_v28, %v74_v27 }
  0x9c   :  { %v77_v30 = vrot.slane %v76_v29, 1 }
  0x9e   :  { %v78_v31 = vadd.f32 %v77_v30, %v76_v29 }
  0xa0   :  { %98 = vpush %v78_v31 }
  0xd1   :  { %s99_s15 = spop %98 }
  0xd2   :  { %81 = sst [smem:[#allocation8]] %s99_s15 }
  0xd3   :  { %90 = dma.smem_to_hbm %s147_s16, 16, %s88_s14, [#allocation7]  }
  0xd4   :  { %142 = dma.done.wait [#allocation7], 16  }
  0xd5   :  { %143 = vsyncadd [#allocation7], 4294967280 }
  0xd6   :  { %95 = sfence }
  0xd7   :  { %96 = vsyncpa [#allocation6], 1 }
  0xd8   :  { %97 = vsyncpa [#allocation7], 1 }

</bundles_post_ra>
